<compile_context>
chip_gen: v7x
topology: tpu7x:2x2x1
jax: 0.10.0
libtpu: 0.0.40
codegen_flags: <defaults>
</compile_context>

<pallas_src>
import jax
import jax.numpy as jnp
from jax.experimental import pallas as pl
from jax.experimental.pallas import tpu as pltpu

EPS = 1e-5


# --------------------------------------------------------------------------
# Hardware / tiling configuration
# --------------------------------------------------------------------------
def _hw_config():
    """Generation-gated VMEM limit and tile-size targets."""
    phys_vmem = 128 * 1024 * 1024
    try:
        info = pltpu.get_tpu_info()
        phys_vmem = int(getattr(info, "vmem_capacity_bytes", phys_vmem))
    except Exception:
        pass
    is_v5e = False
    try:
        kind = jax.devices()[0].device_kind.lower()
        is_v5e = ("v5 lite" in kind) or ("v5e" in kind) or ("v5litepod" in kind)
    except Exception:
        pass
    # v7x: 64 MiB physical -> 48 MiB scoped; v5e/v6e: 128 MiB -> 96 MiB scoped.
    vmem_limit = min((phys_vmem * 3) // 4, 96 * 1024 * 1024)
    return {
        "vmem_limit": vmem_limit,
        # two-sweep streaming tile target (~8 MiB v7x, ~16 MiB v5e/v6e)
        "tile_bytes": max(4 * 1024 * 1024, vmem_limit // 6),
        # max f32 bytes of a resident (N, c_blk, L) slab for the fused path
        "resident_bytes": max(2 * 1024 * 1024, vmem_limit // 8),
        "is_v5e": is_v5e,
    }


def _sum_leading(a):
    """Sum over the leading (non-layout) axis with plain VALU adds."""
    n = a.shape[0]
    if n == 1:
        return a[0]
    if n <= 64:                       # unrolled adds: identical cost, safest lowering
        acc = a[0]
        for i in range(1, n):
            acc = acc + a[i]
        return acc
    return jnp.sum(a, axis=0)


# --------------------------------------------------------------------------
# Single-pass (VMEM-resident) kernels
# --------------------------------------------------------------------------
def _bn3d_resident(x3d, gb, c_blk, cfg):
    """BN over (N, L) per channel; grid over channel blocks, slab resident."""
    N, C, L = x3d.shape
    inv_count = 1.0 / float(N * L)

    def kernel(x_ref, gb_ref, o_ref):
        x = x_ref[...].astype(jnp.float32)                    # (N, cb, L)
        # Reduce over the batch axis first (pure VALU adds); the one cross-lane
        # reduce then only touches 1/N of the elements (keeps XLU off the path).
        s_cl = _sum_leading(x)                                # (cb, L)
        mean = jnp.sum(s_cl, axis=-1, keepdims=True) * inv_count   # (cb, 1)
        xc = x - mean[None]
        v_cl = _sum_leading(xc * xc)                          # (cb, L)
        var = jnp.sum(v_cl, axis=-1, keepdims=True) * inv_count    # (cb, 1)
        inv = jax.lax.rsqrt(var + EPS)
        scale = gb_ref[:, 0:1] * inv                          # (cb, 1)
        shift = gb_ref[:, 1:2] - mean * scale
        o_ref[...] = (x * scale[None] + shift[None]).astype(o_ref.dtype)

    grid = (pl.cdiv(C, c_blk),)
    return pl.pallas_call(
        kernel,
        out_shape=jax.ShapeDtypeStruct((N, C, L), x3d.dtype),
        grid=grid,
        in_specs=[
            pl.BlockSpec((N, c_blk, L), lambda c: (0, c, 0)),
            pl.BlockSpec((c_blk, 2), lambda c: (c, 0)),
        ],
        out_specs=pl.BlockSpec((N, c_blk, L), lambda c: (0, c, 0)),
        compiler_params=pltpu.CompilerParams(
            dimension_semantics=("parallel",),
            vmem_limit_bytes=cfg["vmem_limit"]),
    )(x3d, gb)


def _bn1d_resident(x2d, gb2, c_blk, cfg):
    """BatchNorm1d on (N, C): stats over the batch/sublane axis, C on lanes."""
    N, C = x2d.shape
    inv_n = 1.0 / float(N)

    def kernel(x_ref, gb_ref, o_ref):
        x = x_ref[...].astype(jnp.float32)                    # (N, cb)
        mean = jnp.sum(x, axis=0, keepdims=True) * inv_n      # (1, cb)
        xc = x - mean
        var = jnp.sum(xc * xc, axis=0, keepdims=True) * inv_n
        inv = jax.lax.rsqrt(var + EPS)
        scale = gb_ref[0:1, :] * inv                          # (1, cb)
        shift = gb_ref[1:2, :] - mean * scale
        o_ref[...] = (x * scale + shift).astype(o_ref.dtype)

    grid = (pl.cdiv(C, c_blk),)
    return pl.pallas_call(
        kernel,
        out_shape=jax.ShapeDtypeStruct((N, C), x2d.dtype),
        grid=grid,
        in_specs=[
            pl.BlockSpec((N, c_blk), lambda c: (0, c)),
            pl.BlockSpec((2, c_blk), lambda c: (0, c)),
        ],
        out_specs=pl.BlockSpec((N, c_blk), lambda c: (0, c)),
        compiler_params=pltpu.CompilerParams(
            dimension_semantics=("parallel",),
            vmem_limit_bytes=cfg["vmem_limit"]),
    )(x2d, gb2)


# --------------------------------------------------------------------------
# Two-sweep fallback (per-channel slab too large for VMEM)
# --------------------------------------------------------------------------
def _choose_fallback_tiles(N, C, L, ebytes, tile_bytes):
    """Lane-dense HW tile + batch-row blocking targeting `tile_bytes` per step."""
    if L <= 256:
        hw_blk = L                                   # full extent
    else:
        by_bytes = (tile_bytes // max(1, C * ebytes)) // 128 * 128
        hw_blk = max(128, min(16384, by_bytes))      # multiple of 128 lanes
        if hw_blk >= L:
            hw_blk = L if (L % 128 == 0) else max(128, (L // 128) * 128)
            hw_blk = min(hw_blk, L)
    # Block several batch rows per step: fills the byte target and restores
    # sublane density when C < 8.  nb must divide N (avoids batch-edge masking).
    max_nb = max(1, tile_bytes // max(1, C * hw_blk * ebytes))
    nb = 1
    for cand in range(min(N, max_nb), 0, -1):
        if N % cand == 0:
            nb = cand
            break
    return nb, hw_blk


def _bn3d_two_sweep(x3d, gamma, beta, cfg):
    N, C, L = x3d.shape
    ebytes = x3d.dtype.itemsize
    nb, hw_blk = _choose_fallback_tiles(N, C, L, ebytes, cfg["tile_bytes"])
    n_nb = N // nb
    n_hw = pl.cdiv(L, hw_blk)
    needs_mask = (L % hw_blk) != 0
    w_acc = 128 if (hw_blk % 128 == 0 and hw_blk > 128) else hw_blk
    n_chunks = hw_blk // w_acc

    # -------- phase 1: per-N-shard partial (sum, sumsq); batch axis parallel --
    def stats_kernel(x_ref, part_ref, sum_acc, sq_acc):
        h_i = pl.program_id(1)

        @pl.when(h_i == 0)
        def _init():
            sum_acc[...] = jnp.zeros_like(sum_acc)
            sq_acc[...] = jnp.zeros_like(sq_acc)

        def accumulate(x):                                     # x: (nb, C, hw) f32
            s2 = _sum_leading(x)                               # (C, hw)  VALU
            q2 = _sum_leading(x * x)                           # (C, hw)  VALU
            s_p = s2[:, 0:w_acc]
            q_p = q2[:, 0:w_acc]
            for j in range(1, n_chunks):                       # aligned lane chunks
                s_p = s_p + s2[:, j * w_acc:(j + 1) * w_acc]
                q_p = q_p + q2[:, j * w_acc:(j + 1) * w_acc]
            sum_acc[...] += s_p
            sq_acc[...] += q_p

        if needs_mask:
            last = pl.num_programs(1) - 1

            @pl.when(h_i != last)
            def _full():
                accumulate(x_ref[...].astype(jnp.float32))

            @pl.when(h_i == last)                              # mask only last tile
            def _edge():
                x = x_ref[...].astype(jnp.float32)
                lane = jax.lax.broadcasted_iota(jnp.int32, x.shape, 2)
                x = jnp.where(h_i * hw_blk + lane < L, x, 0.0)
                accumulate(x)
        else:
            accumulate(x_ref[...].astype(jnp.float32))

        @pl.when(h_i == pl.num_programs(1) - 1)
        def _finalize():
            # one cross-lane reduce per shard (not per step)
            part_ref[:, 0:1] = jnp.sum(sum_acc[...], axis=-1, keepdims=True)
            part_ref[:, 1:2] = jnp.sum(sq_acc[...], axis=-1, keepdims=True)

    partials = pl.pallas_call(
        stats_kernel,
        out_shape=jax.ShapeDtypeStruct((n_nb, C, 2), jnp.float32),
        grid=(n_nb, n_hw),
        in_specs=[pl.BlockSpec((nb, C, hw_blk), lambda n, h: (n, 0, h))],
        out_specs=pl.BlockSpec((None, C, 2), lambda n, h: (n, 0, 0)),
        scratch_shapes=[pltpu.VMEM((C, w_acc), jnp.float32),
                        pltpu.VMEM((C, w_acc), jnp.float32)],
        compiler_params=pltpu.CompilerParams(
            dimension_semantics=("parallel", "arbitrary"),
            vmem_limit_bytes=cfg["vmem_limit"]),
    )(x3d)

    # -------- tiny JAX epilogue: combine shards + fold affine -----------------
    inv_count = 1.0 / float(N * L)
    sums = jnp.sum(partials[..., 0], axis=0)
    sqs = jnp.sum(partials[..., 1], axis=0)
    mean = sums * inv_count
    var = jnp.maximum(sqs * inv_count - mean * mean, 0.0)   # guard cancellation
    inv = jax.lax.rsqrt(var + EPS)
    scale = gamma.astype(jnp.float32) * inv
    shift = beta.astype(jnp.float32) - mean * scale
    scale_shift = jnp.stack([scale, shift], axis=-1)        # (C, 2)

    # -------- phase 2: y = x * scale + shift (single FMA per element) ---------
    def norm_kernel(x_ref, ss_ref, o_ref):
        x = x_ref[...].astype(jnp.float32)                  # (nb, C, hw)
        s = ss_ref[:, 0:1][None]                            # (1, C, 1)
        b = ss_ref[:, 1:2][None]
        o_ref[...] = (x * s + b).astype(o_ref.dtype)

    x_spec = pl.BlockSpec((nb, C, hw_blk), lambda n, h: (n, 0, h))
    if cfg["is_v5e"]:
        # Deeper input pipelining hides v5e's longer per-tile DMA latency.
        try:
            x_spec = pl.BlockSpec((nb, C, hw_blk), lambda n, h: (n, 0, h),
                                  pipeline_mode=pl.Buffered(3))
        except Exception:
            pass

    out = pl.pallas_call(
        norm_kernel,
        out_shape=jax.ShapeDtypeStruct((N, C, L), x3d.dtype),
        grid=(n_nb, n_hw),
        in_specs=[x_spec, pl.BlockSpec((C, 2), lambda n, h: (0, 0))],
        out_specs=pl.BlockSpec((nb, C, hw_blk), lambda n, h: (n, 0, h)),
        compiler_params=pltpu.CompilerParams(
            dimension_semantics=("parallel", "parallel"),
            vmem_limit_bytes=cfg["vmem_limit"]),
    )(x3d, scale_shift)
    return out


# --------------------------------------------------------------------------
# Dispatch
# --------------------------------------------------------------------------
def _bn_forward_3d(x3d, gamma, beta, cfg=None):
    """Training-mode BN forward. x3d: (N, C, L); stats over (N, L)."""
    if cfg is None:
        cfg = _hw_config()
    N, C, L = x3d.shape
    gb = jnp.stack([gamma.astype(jnp.float32), beta.astype(jnp.float32)], axis=-1)
    per_channel_f32 = N * L * 4
    budget = cfg["resident_bytes"]
    c_blk = None
    if per_channel_f32 <= budget:
        cmax = budget // per_channel_f32
        if cmax >= C:
            c_blk = C                      # whole tensor in one (or few) blocks
        elif cmax >= 8:
            c_blk = int(cmax // 8) * 8     # multiple of 8 sublanes
    if c_blk is not None:
        return _bn3d_resident(x3d, gb, c_blk, cfg)
    return _bn3d_two_sweep(x3d, gamma, beta, cfg)


def _bn_forward_2d(x2d, gamma, beta, cfg=None):
    """BatchNorm1d on (N, C): keep C on lanes (lane-dense, no transpose)."""
    if cfg is None:
        cfg = _hw_config()
    N, C = x2d.shape
    budget = cfg["resident_bytes"]
    col_f32 = N * 4
    c_blk = None
    if C * col_f32 <= budget:
        c_blk = C
    elif 128 * col_f32 <= budget:
        c_blk = min(C, (budget // col_f32) // 128 * 128)
    if c_blk is not None:
        gb2 = jnp.stack([gamma, beta], axis=0).astype(jnp.float32)   # (2, C)
        return _bn1d_resident(x2d, gb2, c_blk, cfg)
    # Rare: N far too large for a (N, 128)-column slab (N >> 128), so putting
    # the reduction axis on lanes via a transpose is acceptable here.
    return _bn_forward_3d(x2d.T[None], gamma, beta, cfg)[0].T


class MultiBatchNormPallas:
    """JAX/Pallas port of MultiBatchNorm forward pass (training-mode stats)."""

    def __init__(self, dim, types, num_features, momentum=None, key=None):
        assert isinstance(types, list) and len(types) > 1
        assert 'base' in types
        assert dim in ('1d', '2d')
        self.dim = dim
        self.types = types
        self.momentum = momentum  # only affects running-stat updates (not modeled)
        self._cfg = _hw_config()
        if key is None:
            key = jax.random.PRNGKey(0)
        # PyTorch default init is weight=1, bias=0; perturb deterministically so
        # the affine path is actually exercised.
        self.params = {}
        for i, t in enumerate(sorted(types)):
            kg, kb = jax.random.split(jax.random.fold_in(key, i))
            g = 1.0 + 0.1 * jax.random.normal(kg, (num_features,), jnp.float32)
            b = 0.1 * jax.random.normal(kb, (num_features,), jnp.float32)
            self.params[t] = (g, b)
        self.t = 'base'

    def __call__(self, x):
        assert self.t in self.types
        gamma, beta = self.params[self.t]
        if self.dim == '2d':
            N, C, H, W = x.shape
            out = _bn_forward_3d(x.reshape(N, C, H * W), gamma, beta, self._cfg)
            out = out.reshape(N, C, H, W)
        else:
            if x.ndim == 2:
                out = _bn_forward_2d(x, gamma, beta, self._cfg)
            else:
                out = _bn_forward_3d(x, gamma, beta, self._cfg)
        self.t = 'base'
        return out


# --------------------------------------------------------------------------
# References + self-test
# --------------------------------------------------------------------------
def _reference_bn2d(x, gamma, beta):
    mean = jnp.mean(x, axis=(0, 2, 3), keepdims=True)
    var = jnp.mean((x - mean) ** 2, axis=(0, 2, 3), keepdims=True)
    return (x - mean) / jnp.sqrt(var + EPS) * gamma.reshape(1, -1, 1, 1) \
        + beta.reshape(1, -1, 1, 1)


def _reference_bn1d(x, gamma, beta):
    mean = jnp.mean(x, axis=0, keepdims=True)
    var = jnp.mean((x - mean) ** 2, axis=0, keepdims=True)
    return (x - mean) / jnp.sqrt(var + EPS) * gamma.reshape(1, -1) \
        + beta.reshape(1, -1)


if __name__ == "__main__":
    key = jax.random.PRNGKey(0)
    kx, k1, kp = jax.random.split(key, 3)

    # --- 2d path: (N, C, H, W) ---
    N, C, H, W = 2, 4, 16, 16
    x = jax.random.normal(kx, (N, C, H, W), jnp.float32)
    mbn2d = MultiBatchNormPallas(dim='2d', types=['base', 'aux'],
                                 num_features=C, key=kp)
    out2d = jax.block_until_ready(mbn2d(x))
    g2, b2 = mbn2d.params['base']
    ref2d = _reference_bn2d(x, g2, b2)
    assert out2d.shape == (N, C, H, W)
    assert jnp.allclose(out2d, ref2d, atol=1e-4, rtol=1e-4)

    # --- 1d path: (N, C) ---
    Nb, F = 8, 32
    x1 = jax.random.normal(k1, (Nb, F), jnp.float32)
    mbn1d = MultiBatchNormPallas(dim='1d', types=['base', 'aux'],
                                 num_features=F, key=kp)
    out1d = jax.block_until_ready(mbn1d(x1))
    g1, b1 = mbn1d.params['base']
    ref1d = _reference_bn1d(x1, g1, b1)
    assert out1d.shape == (Nb, F)
    assert jnp.allclose(out1d, ref1d, atol=1e-4, rtol=1e-4)

    print("KERNEL_OK")
</pallas_src>

<mosaic_0001>
module attributes {stable_mosaic.version = 11 : i64} {
  func.func @kernel(%arg0: i32, %arg1: memref<2x4x256xf32, #tpu.memory_space<vmem>>, %arg2: memref<4x2xf32, #tpu.memory_space<vmem>>, %arg3: memref<2x4x256xf32, #tpu.memory_space<vmem>>) attributes {dimension_semantics = [#tpu.dimension_semantics<parallel>], iteration_bounds = array<i64: 1>, scalar_prefetch = 0 : i64, scratch_operands = 0 : i64, tpu.core_type = #tpu.core_type<tc>, window_params = [{transform_indices = @transform_0, window_bounds = array<i64: 2, 4, 256>}, {transform_indices = @transform_1, window_bounds = array<i64: 4, 2>}, {transform_indices = @transform_2, window_bounds = array<i64: 2, 4, 256>}]} {
    %c0 = arith.constant 0 : index
    %c0_0 = arith.constant 0 : index
    %c0_1 = arith.constant 0 : index
    %0 = vector.load %arg1[%c0, %c0_0, %c0_1] : memref<2x4x256xf32, #tpu.memory_space<vmem>>, vector<2x4x256xf32>
    %1 = vector.extract_strided_slice %0 {offsets = [0, 0, 0], sizes = [1, 4, 256], strides = [1, 1, 1]} : vector<2x4x256xf32> to vector<1x4x256xf32>
    %2 = vector.shape_cast %1 : vector<1x4x256xf32> to vector<4x256xf32>
    %3 = vector.extract_strided_slice %0 {offsets = [1, 0, 0], sizes = [1, 4, 256], strides = [1, 1, 1]} : vector<2x4x256xf32> to vector<1x4x256xf32>
    %4 = vector.shape_cast %3 : vector<1x4x256xf32> to vector<4x256xf32>
    %5 = arith.addf %2, %4 : vector<4x256xf32>
    %cst = arith.constant dense<0.000000e+00> : vector<4xf32>
    %6 = vector.multi_reduction <add>, %5, %cst [1] : vector<4x256xf32> to vector<4xf32>
    %7 = vector.shape_cast %6 : vector<4xf32> to vector<4x1xf32>
    %cst_2 = arith.constant 0.001953125 : f32
    %8 = vector.broadcast %cst_2 : f32 to vector<4x1xf32>
    %9 = arith.mulf %7, %8 : vector<4x1xf32>
    %10 = vector.shape_cast %9 : vector<4x1xf32> to vector<1x4x1xf32>
    %11 = vector.broadcast %10 : vector<1x4x1xf32> to vector<2x4x256xf32>
    %12 = arith.subf %0, %11 : vector<2x4x256xf32>
    %13 = arith.mulf %12, %12 : vector<2x4x256xf32>
    %14 = vector.extract_strided_slice %13 {offsets = [0, 0, 0], sizes = [1, 4, 256], strides = [1, 1, 1]} : vector<2x4x256xf32> to vector<1x4x256xf32>
    %15 = vector.shape_cast %14 : vector<1x4x256xf32> to vector<4x256xf32>
    %16 = vector.extract_strided_slice %13 {offsets = [1, 0, 0], sizes = [1, 4, 256], strides = [1, 1, 1]} : vector<2x4x256xf32> to vector<1x4x256xf32>
    %17 = vector.shape_cast %16 : vector<1x4x256xf32> to vector<4x256xf32>
    %18 = arith.addf %15, %17 : vector<4x256xf32>
    %cst_3 = arith.constant dense<0.000000e+00> : vector<4xf32>
    %19 = vector.multi_reduction <add>, %18, %cst_3 [1] : vector<4x256xf32> to vector<4xf32>
    %20 = vector.shape_cast %19 : vector<4xf32> to vector<4x1xf32>
    %cst_4 = arith.constant 0.001953125 : f32
    %21 = vector.broadcast %cst_4 : f32 to vector<4x1xf32>
    %22 = arith.mulf %20, %21 : vector<4x1xf32>
    %cst_5 = arith.constant 9.99999974E-6 : f32
    %23 = vector.broadcast %cst_5 : f32 to vector<4x1xf32>
    %24 = arith.addf %22, %23 : vector<4x1xf32>
    %25 = math.rsqrt %24 : vector<4x1xf32>
    %c0_6 = arith.constant 0 : index
    %c0_7 = arith.constant 0 : index
    %26 = vector.load %arg2[%c0_6, %c0_7] : memref<4x2xf32, #tpu.memory_space<vmem>>, vector<4x1xf32>
    %27 = arith.mulf %26, %25 : vector<4x1xf32>
    %c0_8 = arith.constant 0 : index
    %c1 = arith.constant 1 : index
    %28 = vector.load %arg2[%c0_8, %c1] : memref<4x2xf32, #tpu.memory_space<vmem>>, vector<4x1xf32>
    %29 = arith.mulf %9, %27 : vector<4x1xf32>
    %30 = arith.subf %28, %29 : vector<4x1xf32>
    %31 = vector.shape_cast %27 : vector<4x1xf32> to vector<1x4x1xf32>
    %32 = vector.broadcast %31 : vector<1x4x1xf32> to vector<2x4x256xf32>
    %33 = arith.mulf %0, %32 : vector<2x4x256xf32>
    %34 = vector.shape_cast %30 : vector<4x1xf32> to vector<1x4x1xf32>
    %35 = vector.broadcast %34 : vector<1x4x1xf32> to vector<2x4x256xf32>
    %36 = arith.addf %33, %35 : vector<2x4x256xf32>
    %c0_9 = arith.constant 0 : index
    %c0_10 = arith.constant 0 : index
    %c0_11 = arith.constant 0 : index
    %37 = vector.load %arg3[%c0_9, %c0_10, %c0_11] : memref<2x4x256xf32, #tpu.memory_space<vmem>>, vector<2x4x256xf32>
    tpu.vector_store %arg3[%c0_9, %c0_10, %c0_11], %36 {strides = array<i32>} : memref<2x4x256xf32, #tpu.memory_space<vmem>>, vector<2x4x256xf32>,
    return
  }
  func.func @transform_0(%arg0: i32) -> (i32, i32, i32) {
    %c0_i32 = arith.constant 0 : i32
    %c0_i32_0 = arith.constant 0 : i32
    %c0_i32_1 = arith.constant 0 : i32
    return %c0_i32, %arg0, %c0_i32_0 : i32, i32, i32
  }
  func.func @transform_1(%arg0: i32) -> (i32, i32) {
    %c0_i32 = arith.constant 0 : i32
    %c0_i32_0 = arith.constant 0 : i32
    return %arg0, %c0_i32 : i32, i32
  }
  func.func @transform_2(%arg0: i32) -> (i32, i32, i32) {
    %c0_i32 = arith.constant 0 : i32
    %c0_i32_0 = arith.constant 0 : i32
    %c0_i32_1 = arith.constant 0 : i32
    return %c0_i32, %arg0, %c0_i32_0 : i32, i32, i32
  }
}

</mosaic_0001>

<bundles_post_ra>
// kernel: tpu_custom_call.1
= control target key start
LH: loop header
LB: loop body
LE: loop exit
PB: predicated region body
PF: predicated region fallthrough
CT: control target
= control target key end

     0   :  { %7 = vsyncpa [#allocation3], 0  ;;  %s287_s0 = inlined_call_operand.hbm [shape: f32[2,4,256], index: 0, kind: input, shape index: {}]   ;;  %s288_s1 = inlined_call_operand.hbm [shape: f32[4,2], index: 1, kind: input, shape index: {}]   ;;  %s289_s2 = inlined_call_operand.hbm [shape: f32[2,4,256], index: 2, kind: output, shape index: {}]  }
   0x1   :  { %8 = vsyncpa [#allocation6], 0 }
   0x2   :  { %9 = vsyncpa [#allocation4], 0  ;;  %s217_s9 = smov [#allocation2]   ;;  %s145_s13 = scalar_lea.hbm %s287_s0, 256 }
   0x3   :  { %s15_s10 = sshll.u32 %s217_s9, 4  ;;  %p146_p0 = scmp.ne.s32.totalorder %s287_s0, %s145_s13  ;;  %s16_s10 = int_to_ptr.vmem [resolvable:$true] %s15_s10 }
   0x4   :  { %p149_p1 = scmp.lt.u32.totalorder %s145_s13, %s287_s0 }
   0x6   :  { %p151_p2 = pnand %p149_p1, %p146_p0 }
   0x8   :  { %154 = shalt.err (!%p151_p2)
}
   0x9   :  { %s155_s18 = scalar_lea.vmem %s16_s10, 256  ;;  %p160_p4 = scmp.lt.s32.totalorder %s16_s10, %s16_s10 }
   0xa   :  { %p156_p3 = scmp.ne.s32.totalorder %s16_s10, %s155_s18  ;;  %p161_p5 = scmp.lt.s32.totalorder %s155_s18, %s155_s18 }
   0xc   :  { %p162_p6 = por %p161_p5, %p160_p4 }
   0xe   :  { %p163_p7 = pnand %p162_p6, %p156_p3 }
  0x10   :  { %166 = shalt.err (!%p163_p7)
}
  0x11   :  { %s218_s19 = smov 128   ;;  %s219_s20 = smov 8  }
  0x12   :  { %21 = dma.hbm_to_vmem [thread:$0]  %s287_s0, 256, %s16_s10, [#allocation3], %s218_s19, %s218_s19, %s219_s20  }
  0x13   :  { %s220_s23 = smov [#allocation5]   ;;  %s167_s27 = scalar_lea.hbm %s288_s1, 64 }
  0x14   :  { %s28_s24 = sshll.u32 %s220_s23, 4  ;;  %p168_p8 = scmp.ne.s32.totalorder %s288_s1, %s167_s27  ;;  %s29_s24 = int_to_ptr.vmem [resolvable:$true] %s28_s24 }
  0x15   :  { %p171_p9 = scmp.lt.u32.totalorder %s167_s27, %s288_s1 }
  0x17   :  { %p173_p10 = pnand %p171_p9, %p168_p8 }
  0x19   :  { %176 = shalt.err (!%p173_p10)
}
  0x1a   :  { %s177_s4 = scalar_lea.vmem %s29_s24, 64  ;;  %p182_p12 = scmp.lt.s32.totalorder %s29_s24, %s29_s24 }
  0x1b   :  { %p178_p11 = scmp.ne.s32.totalorder %s29_s24, %s177_s4  ;;  %p183_p13 = scmp.lt.s32.totalorder %s177_s4, %s177_s4 }
  0x1d   :  { %p184_p0 = por %p183_p13, %p182_p12 }
  0x1f   :  { %p185_p1 = pnand %p184_p0, %p178_p11 }
  0x21   :  { %188 = shalt.err (!%p185_p1)
}
  0x22   :  { %31 = dma.hbm_to_vmem [thread:$0]  %s288_s1, 64, %s29_s24, [#allocation6]  }
  0x23   :  { %211 = dma.done.wait [#allocation3], 256  }
  0x24   :  { %212 = vsyncadd [#allocation3], 4294967040 }
  0x25   :  { %213 = dma.done.wait [#allocation6], 64  }
  0x26   :  { %214 = vsyncadd [#allocation6], 4294967232  ;;  %v38_v0 = vld [vmem:[#allocation2] sm:$0xff]  ;;  %v39_v1 = vld [vmem:[#allocation2 + $0x8] sm:$0xff]  ;;  %vm44_vm0 = vcmask 1043456   ;;  %v55_v9 = vlaneseq  ;;  %v222_v25 = vmov 0  }
  0x27   :  { %v40_v2 = vadd.f32 %v39_v1, %v38_v0  ;;  %v221_v7 = vmov 839922192   ;;  %141 = vset.pattern.permute.xlu1 %v222_v25  ;;  %v223_v29 = vmov 1   ;;  %v76_v30 = vld [vmem:[#allocation5] sm:$0xf]  ;;  %s224_s1 = smov 1  }
  0x28   :  { %v53_v8 = vunpack.c.l.s4 %v221_v7  ;;  %v56_v11 = vshrl.u32 %v55_v9, 7  ;;  %142 = vset.pattern.permute.xlu0 %v223_v29  ;;  %s225_s6 = smov [#allocation7]  }
  0x29   :  { %v42_v3 = vcombine.high %v40_v2, %v40_v2  ;;  %v45_v4 = vsel %vm44_vm0, %v40_v2, 0.0  ;;  %s119_s7 = sshll.u32 %s225_s6, 4  ;;  %s120_s7 = int_to_ptr.vmem [resolvable:$true] %s119_s7 }
  0x2a   :  { %v54_v10 = vunpack.c.0.s8 %v53_v8  ;;  %s189_s8 = scalar_lea.vmem %s120_s7, 256  ;;  %p194_p3 = scmp.lt.s32.totalorder %s120_s7, %s120_s7 }
  0x2b   :  { %v46_v5 = vsel %vm44_vm0, %v42_v3, 0.0  ;;  %p190_p2 = scmp.ne.s32.totalorder %s120_s7, %s189_s8  ;;  %p195_p4 = scmp.lt.s32.totalorder %s189_s8, %s189_s8 }
  0x2c   :  { %v47_v6 = vadd.f32 %v46_v5, %v45_v4  ;;  %v57_v12 = vsub.s32 %v54_v10, %v56_v11 }
  0x2d   :  { %p196_p5 = por %p195_p4, %p194_p3 }
  0x2e   :  { %48 = vadd.xlane.f32.xlu0 %v47_v6 }
  0x2f   :  { %p197_p6 = pnand %p196_p5, %p190_p2 }
  0xbb   :  { %v49_v13 = vpop.xlane.xlu0 %48 }
  0xbc   :  { %v50_v14 = vmul.f32 0.001953125, %v49_v13 }
  0xbe   :  { %v58_v15 = vrot.slane %v50_v14, %v57_v12 }
  0xc0   :  { %v60_v16 = vsub.f32 %v38_v0, %v58_v15  ;;  %v61_v17 = vsub.f32 %v39_v1, %v58_v15 }
  0xc2   :  { %v62_v18 = vmul.f32 %v60_v16, %v60_v16  ;;  %v63_v19 = vmul.f32 %v61_v17, %v61_v17 }
  0xc4   :  { %v64_v20 = vadd.f32 %v63_v19, %v62_v18 }
  0xc6   :  { %v66_v21 = vcombine.high %v64_v20, %v64_v20  ;;  %v68_v22 = vsel %vm44_vm0, %v64_v20, 0.0 }
  0xc8   :  { %v69_v23 = vsel %vm44_vm0, %v66_v21, 0.0 }
  0xc9   :  { %v70_v24 = vadd.f32 %v69_v23, %v68_v22 }
  0xcb   :  { %71 = vadd.xlane.f32.xlu0 %v70_v24 }
 0x158   :  { %v72_v26 = vpop.xlane.xlu0 %71 }
 0x159   :  { %v73_v27 = vmul.f32 0.001953125, %v72_v26 }
 0x15b   :  { %v74_v28 = vadd.f32 1e-05, %v73_v27 }
 0x15d   :  { %143 = vrsqrt.f32 %v74_v28 }
 0x167   :  { %v144_v31 = vpop.eup %143 }
 0x168   :  { %v77_v32 = vmul.f32 %v144_v31, %v76_v30 }
 0x16a   :  { %v78_v33 = vmul.f32 %v77_v32, %v50_v14 }
 0x16c   :  { %80 = vrot.lane.b32.xlu1 %v78_v33, %s224_s1 }
 0x170   :  { %86 = vperm.xlu1 %141, %v77_v32  }
 0x1de   :  { %v81_v34 = vpop.permute.xlu1 %80 }
 0x1df   :  { %v83_v35 = vsub.f32 %v76_v30, %v81_v34 }
 0x1e1   :  { %100 = vperm.xlu0 %142, %v83_v35  }
 0x1ef   :  { %v87_v36 = vpop.permute.xlu1 %86 }
 0x1f0   :  { %v94_v37 = vrot.slane %v87_v36, %v57_v12 }
 0x1f2   :  { %v96_v39 = vmul.f32 %v94_v37, %v38_v0  ;;  %v97_v40 = vmul.f32 %v94_v37, %v39_v1 }
 0x260   :  { %v101_v38 = vpop.permute.xlu0 %100 }
 0x261   :  { %v108_v41 = vrot.slane %v101_v38, %v57_v12 }
 0x263   :  { %v110_v42 = vadd.f32 %v108_v41, %v96_v39  ;;  %v111_v43 = vadd.f32 %v108_v41, %v97_v40 }
 0x265   :  { %112 = vst [vmem:[#allocation7] sm:$0xff] %v110_v42  ;;  %113 = vst [vmem:[#allocation7 + $0x8] sm:$0xff] %v111_v43 }
 0x266   :  { %200 = shalt.err (!%p197_p6)
}
 0x267   :  { %s201_s11 = scalar_lea.hbm %s289_s2, 256 }
 0x268   :  { %p202_p7 = scmp.ne.s32.totalorder %s289_s2, %s201_s11  ;;  %p205_p8 = scmp.lt.u32.totalorder %s201_s11, %s289_s2 }
 0x26a   :  { %p207_p9 = pnand %p205_p8, %p202_p7 }
 0x26c   :  { %210 = shalt.err (!%p207_p9)
}
 0x26d   :  { %125 = dma.vmem_to_hbm [thread:$0]  %s120_s7, 256, %s289_s2, [#allocation4], %s218_s19, %s218_s19, %s219_s20  }
 0x26e   :  { %215 = dma.done.wait [#allocation4], 256  }
 0x26f   :  { %216 = vsyncadd [#allocation4], 4294967040 }
 0x270   :  { %129 = vsyncpa [#allocation3], 1 }
 0x271   :  { %130 = vsyncpa [#allocation6], 1 }
 0x272   :  { %131 = vsyncpa [#allocation4], 1 }

</bundles_post_ra>
